<compile_context>
chip_gen: v5e
topology: v5e:2x2
jax: 0.10.0
libtpu: 0.0.40
codegen_flags: <defaults>
</compile_context>

<pallas_src>
import math
import jax
import jax.numpy as jnp
from jax.experimental import pallas as pl
from jax.experimental.pallas import tpu as pltpu

# ---------------- model dimensions (small, synthetic) ----------------
B = 2            # batch
C = 3            # input channels
IMG = 16         # image height/width
PATCH = 8        # patch size
N_PATCH = (IMG // PATCH) ** 2          # 4 patches
D_PATCH = C * PATCH * PATCH            # 192 flattened patch dim
D = 32           # hidden size
NUM_HEADS = 2
HEAD_DIM = D // NUM_HEADS              # 16
D_MLP = 4 * D                          # 128
SEQ = N_PATCH + 1                      # 5 tokens ([CLS] + patches)
SEQ_PAD = 8                            # pad tokens to a full sublane tile
T_TOK = B * SEQ_PAD                    # 16 stacked token rows for the whole batch
HEAD_HID = 64    # projection head hidden
OUT_DIM = 16     # projection head output
EPS = 1e-6
NEG_INF = -1e30

# ---------------- packed-slab geometry ----------------
# main slab (bf16): rows [0:T_TOK] = patch activations (lanes 0:D_PATCH),
#                   rows [T_TOK:T_TOK+D] = D-row weights, one 128-lane slot each.
MAIN_ROWS = T_TOK + D                  # 48 (multiple of the bf16 16-row tile)
MAIN_LANES = 4 * 128                   # qkv@0 | w1@128 | wo@256 | hw1@384
LANE_QKV = 0
LANE_W1 = 128
LANE_WO = 256
LANE_WH1 = 384
# tall-weight slab (bf16): patch_w ; w2 ; hw2 stacked along sublanes -> (384, D)
WT_ROWS = D_PATCH + D_MLP + HEAD_HID
# vector slab (f32, 128 lanes): tok_base rows, attn_bias rows (lane 0), 12 vector rows
VEC_ROWS = 2 * T_TOK + 16              # 48 (padded to a multiple of 8)


def _layernorm(x, g, b):
    # var = E[x^2] - mu^2: both reductions are independent (shorter XLU chain),
    # gamma folded into the rsqrt scale.
    mu = jnp.mean(x, axis=-1, keepdims=True)
    ms = jnp.mean(x * x, axis=-1, keepdims=True)
    inv = jax.lax.rsqrt(ms - mu * mu + EPS)
    scale = inv * g
    return x * scale + (b - mu * scale)


def _gelu(x):
    # tanh-approximate GELU (lowers to the EUP tanh unit).
    # TODO(synk): PyTorch nn.GELU defaults to the exact erf form; difference is ~1e-3.
    return 0.5 * x * (1.0 + jnp.tanh(0.7978845608028654 * (x + 0.044715 * x * x * x)))


def dinov2_kernel(main_ref, wtall_ref, vec_ref, out_ref):
    # ---------------- unpack slabs (static, tile-aligned slices only) ------------
    main = main_ref[...]                               # (MAIN_ROWS, MAIN_LANES) bf16
    patches = main[0:T_TOK, 0:D_PATCH]                 # (T_TOK, D_PATCH) bf16
    r0 = T_TOK
    w_qkv = main[r0:r0 + D, LANE_QKV:LANE_QKV + 3 * D]     # (D, 3D)  fused Q|K|V
    w_1 = main[r0:r0 + D, LANE_W1:LANE_W1 + D_MLP]         # (D, D_MLP)
    w_o = main[r0:r0 + D, LANE_WO:LANE_WO + D]             # (D, D)
    w_h1 = main[r0:r0 + D, LANE_WH1:LANE_WH1 + HEAD_HID]   # (D, HEAD_HID)

    wt = wtall_ref[...]                                # (WT_ROWS, D) bf16
    patch_w = wt[0:D_PATCH, :]                         # (D_PATCH, D)
    w_2 = wt[D_PATCH:D_PATCH + D_MLP, :]               # (D_MLP, D)
    w_h2 = wt[D_PATCH + D_MLP:WT_ROWS, 0:OUT_DIM]      # (HEAD_HID, OUT_DIM)

    vec = vec_ref[...]                                 # (VEC_ROWS, 128) f32
    tok_base = vec[0:T_TOK, 0:D]                       # folded cls / pos / patch_b
    attn_bias = vec[T_TOK:2 * T_TOK, 0:T_TOK]          # block-diag + key-pad mask @ lane 0
    r = 2 * T_TOK
    ln1_g = vec[r + 0:r + 1, 0:D]
    ln1_b = vec[r + 1:r + 2, 0:D]
    b_qkv = vec[r + 2:r + 3, 0:3 * D]                  # bq already carries 1/sqrt(HD)
    b_o = vec[r + 3:r + 4, 0:D]
    ln2_g = vec[r + 4:r + 5, 0:D]
    ln2_b = vec[r + 5:r + 6, 0:D]
    b_1 = vec[r + 6:r + 7, 0:D_MLP]
    b_2 = vec[r + 7:r + 8, 0:D]
    lnf_g = vec[r + 8:r + 9, 0:D]
    lnf_b = vec[r + 9:r + 10, 0:D]
    hb_1 = vec[r + 10:r + 11, 0:HEAD_HID]
    hb_2 = vec[r + 11:r + 12, 0:OUT_DIM]

    # ---------------- patch embedding for the whole batch in one matmul ----------
    # patch rows: [b*SEQ_PAD + s]; CLS slot (s=0) and pad rows (s>=SEQ) are 0.
    x = jnp.dot(patches, patch_w, preferred_element_type=jnp.float32)
    x = x + tok_base                                   # (T_TOK, D) f32

    # ---------------- transformer block: pre-LN multi-head self-attention --------
    xn = _layernorm(x, ln1_g, ln1_b)
    qkv = jnp.dot(xn.astype(jnp.bfloat16), w_qkv,
                  preferred_element_type=jnp.float32) + b_qkv          # (T_TOK, 3D)

    head_outs = []
    for h in range(NUM_HEADS):                         # static 2-iteration unroll
        lo = h * HEAD_DIM
        qh = qkv[:, lo:lo + HEAD_DIM].astype(jnp.bfloat16)
        kh = qkv[:, D + lo:D + lo + HEAD_DIM].astype(jnp.bfloat16)
        vh = qkv[:, 2 * D + lo:2 * D + lo + HEAD_DIM].astype(jnp.bfloat16)
        # softmax scale already folded into wq/bq in the wrapper
        s = jax.lax.dot_general(qh, kh, (((1,), (1,)), ((), ())),
                                preferred_element_type=jnp.float32)
        s = s + attn_bias                              # block-diagonal + pad-key mask
        s = s - jnp.max(s, axis=-1, keepdims=True)
        p = jnp.exp(s)
        p = p * pl.reciprocal(jnp.sum(p, axis=-1, keepdims=True), approx=True)
        head_outs.append(jnp.dot(p.astype(jnp.bfloat16), vh,
                                 preferred_element_type=jnp.float32))  # (T_TOK, HD)
    # single fused output projection: concat(h0,h1) @ w_o (one MXU push/pop)
    attn_cat = jnp.concatenate(head_outs, axis=-1).astype(jnp.bfloat16)
    attn_proj = jnp.dot(attn_cat, w_o, preferred_element_type=jnp.float32)
    x = x + attn_proj + b_o

    # ---------------- transformer block: MLP -------------------------------------
    xn2 = _layernorm(x, ln2_g, ln2_b)
    hmid = _gelu(jnp.dot(xn2.astype(jnp.bfloat16), w_1,
                         preferred_element_type=jnp.float32) + b_1)
    x = x + jnp.dot(hmid.astype(jnp.bfloat16), w_2,
                    preferred_element_type=jnp.float32) + b_2

    # ---------------- final LayerNorm -> last_hidden_state -----------------------
    xf = _layernorm(x, lnf_g, lnf_b)

    # ---------------- projection head (all rows; CLS rows selected outside) ------
    h1 = _gelu(jnp.dot(xf.astype(jnp.bfloat16), w_h1,
                       preferred_element_type=jnp.float32) + hb_1)
    o_all = jnp.dot(h1.astype(jnp.bfloat16), w_h2,
                    preferred_element_type=jnp.float32) + hb_2         # (T_TOK, OUT)

    # one unmasked full-block store (wrapper slices rows ::SEQ_PAD for CLS)
    out_ref[...] = o_all.astype(out_ref.dtype)


def extract_patches(x_nchw):
    # pure glue: NCHW -> (B, N_PATCH, C*PATCH*PATCH), flattened in (c, ph, pw) order
    b, c, h, w = x_nchw.shape
    x = x_nchw.reshape(b, c, h // PATCH, PATCH, w // PATCH, PATCH)
    x = x.transpose(0, 2, 4, 1, 3, 5)
    return x.reshape(b, (h // PATCH) * (w // PATCH), c * PATCH * PATCH)


def _pack_inputs(x_nchw, params):
    """Wrapper-side layout plumbing / weight folding (pure XLA, constant-foldable)."""
    patches = extract_patches(x_nchw).astype(jnp.float32)            # (B, N_PATCH, D_PATCH)
    # tokens on 8-sublane-aligned rows: row 0 = CLS slot (zeros), rows 1..4 = patches,
    # rows 5..7 = padding (zeros).
    patches_pad = jnp.zeros((B, SEQ_PAD, D_PATCH), jnp.float32)
    patches_pad = patches_pad.at[:, 1:1 + N_PATCH, :].set(patches)
    patches_tok = patches_pad.reshape(T_TOK, D_PATCH)

    # Fold cls / pos / patch bias into one additive per-token base (exact).
    tok_base = jnp.zeros((SEQ_PAD, D), jnp.float32)
    tok_base = tok_base.at[0].set(params["cls"][0] + params["pos"][0])
    tok_base = tok_base.at[1:SEQ].set(params["patch_b"][0] + params["pos"][1:SEQ])
    tok_base = jnp.tile(tok_base, (B, 1))                            # (T_TOK, D)

    # Block-diagonal attention bias: same batch AND non-padded key -> 0, else -1e30.
    idx = jnp.arange(T_TOK)
    same_batch = (idx[:, None] // SEQ_PAD) == (idx[None, :] // SEQ_PAD)
    valid_key = (idx[None, :] % SEQ_PAD) < SEQ
    attn_bias = jnp.where(same_batch & valid_key, 0.0, NEG_INF).astype(jnp.float32)

    # Fold the 1/sqrt(HEAD_DIM) softmax scale into wq / bq (exact algebraic fold).
    scale = 1.0 / math.sqrt(HEAD_DIM)
    wq_s = params["wq"] * scale
    bq_s = params["bq"] * scale

    # Main bf16 slab: patch activations + all D-row weights (128-lane slots each).
    main = jnp.zeros((MAIN_ROWS, MAIN_LANES), jnp.float32)
    main = main.at[0:T_TOK, 0:D_PATCH].set(patches_tok)
    r0 = T_TOK
    main = main.at[r0:r0 + D, LANE_QKV:LANE_QKV + 3 * D].set(
        jnp.concatenate([wq_s, params["wk"], params["wv"]], axis=1))
    main = main.at[r0:r0 + D, LANE_W1:LANE_W1 + D_MLP].set(params["w1"])
    main = main.at[r0:r0 + D, LANE_WO:LANE_WO + D].set(params["wo"])
    main = main.at[r0:r0 + D, LANE_WH1:LANE_WH1 + HEAD_HID].set(params["hw1"])
    main = main.astype(jnp.bfloat16)

    # Tall-weight bf16 slab stacked along sublanes -> (384, D)
    hw2_pad = jnp.zeros((HEAD_HID, D), jnp.float32).at[:, :OUT_DIM].set(params["hw2"])
    w_tall = jnp.concatenate([params["patch_w"], params["w2"], hw2_pad],
                             axis=0).astype(jnp.bfloat16)

    # f32 vector slab: token base, attention bias (own rows, lane 0), LN params/biases.
    vec = jnp.zeros((VEC_ROWS, 128), jnp.float32)
    vec = vec.at[0:T_TOK, 0:D].set(tok_base)
    vec = vec.at[T_TOK:2 * T_TOK, 0:T_TOK].set(attn_bias)
    rows = [
        params["ln1_g"], params["ln1_b"],
        jnp.concatenate([bq_s, params["bk"], params["bv"]], axis=1),
        params["bo"],
        params["ln2_g"], params["ln2_b"],
        params["b1"], params["b2"],
        params["lnf_g"], params["lnf_b"],
        params["hb1"], params["hb2"],
    ]
    base = 2 * T_TOK
    for i, v in enumerate(rows):
        v = v.reshape(-1)
        vec = vec.at[base + i, :v.shape[0]].set(v)

    return main, w_tall, vec


def dinov2_forward(x_nchw, params):
    main, w_tall, vec = _pack_inputs(x_nchw, params)

    in_specs = [
        pl.BlockSpec((MAIN_ROWS, MAIN_LANES), lambda i: (0, 0)),
        pl.BlockSpec((WT_ROWS, D), lambda i: (0, 0)),
        pl.BlockSpec((VEC_ROWS, 128), lambda i: (0, 0)),
    ]
    out_spec = pl.BlockSpec((T_TOK, OUT_DIM), lambda i: (0, 0))

    # TODO(synk): if batch grows beyond B=2, add a leading grid axis over batch
    # groups marked "parallel" so v7x can shard across both TensorCores.
    out_full = pl.pallas_call(
        dinov2_kernel,
        out_shape=jax.ShapeDtypeStruct((T_TOK, OUT_DIM), jnp.float32),
        grid_spec=pltpu.PrefetchScalarGridSpec(
            num_scalar_prefetch=0,
            grid=(1,),                       # single step: whole batch at once
            in_specs=in_specs,
            out_specs=out_spec,
        ),
        compiler_params=pltpu.CompilerParams(
            dimension_semantics=("arbitrary",)),
    )(main, w_tall, vec)

    # rows 0, SEQ_PAD, ... are the per-batch CLS tokens (free XLA slice).
    return out_full[::SEQ_PAD]


def init_params(key):
    ks = jax.random.split(key, 16)
    n = lambda k, shp, s=0.02: (s * jax.random.normal(k, shp)).astype(jnp.float32)
    zeros = lambda shp: jnp.zeros(shp, jnp.float32)
    ones = lambda shp: jnp.ones(shp, jnp.float32)
    return {
        # patch embedding (Conv2d(C, D, kernel=PATCH, stride=PATCH) as matmul)
        "patch_w": n(ks[0], (D_PATCH, D)), "patch_b": zeros((1, D)),
        "cls": n(ks[1], (1, D)), "pos": n(ks[2], (SEQ, D)),
        # transformer block
        "ln1_g": ones((1, D)), "ln1_b": zeros((1, D)),
        "wq": n(ks[3], (D, D)), "bq": zeros((1, D)),
        "wk": n(ks[4], (D, D)), "bk": zeros((1, D)),
        "wv": n(ks[5], (D, D)), "bv": zeros((1, D)),
        "wo": n(ks[6], (D, D)), "bo": zeros((1, D)),
        "ln2_g": ones((1, D)), "ln2_b": zeros((1, D)),
        "w1": n(ks[7], (D, D_MLP)), "b1": zeros((1, D_MLP)),
        "w2": n(ks[8], (D_MLP, D)), "b2": zeros((1, D)),
        # final backbone LayerNorm
        "lnf_g": ones((1, D)), "lnf_b": zeros((1, D)),
        # projection head
        "hw1": n(ks[9], (D, HEAD_HID)), "hb1": zeros((1, HEAD_HID)),
        "hw2": n(ks[10], (HEAD_HID, OUT_DIM)), "hb2": zeros((1, OUT_DIM)),
    }


if __name__ == "__main__":
    key = jax.random.PRNGKey(0)
    k_x, k_p = jax.random.split(key)
    x = jax.random.normal(k_x, (B, C, IMG, IMG), dtype=jnp.float32)  # NCHW like PyTorch
    params = init_params(k_p)

    fwd = jax.jit(dinov2_forward)
    out = jax.block_until_ready(fwd(x, params))
    assert out.shape == (B, OUT_DIM)
    assert jnp.isfinite(out).all()
    print("KERNEL_OK")
</pallas_src>

<mosaic_0001>
module attributes {stable_mosaic.version = 11 : i64} {
  func.func @dinov2_kernel(%arg0: i32, %arg1: memref<48x512xbf16, #tpu.memory_space<vmem>>, %arg2: memref<384x32xbf16, #tpu.memory_space<vmem>>, %arg3: memref<48x128xf32, #tpu.memory_space<vmem>>, %arg4: memref<16x16xf32, #tpu.memory_space<vmem>>) attributes {dimension_semantics = [#tpu.dimension_semantics<arbitrary>], iteration_bounds = array<i64: 1>, scalar_prefetch = 0 : i64, scratch_operands = 0 : i64, tpu.core_type = #tpu.core_type<tc>, window_params = [{pipeline_mode = #tpu.pipeline_mode<synchronous>, transform_indices = @transform_0, window_bounds = array<i64: 48, 512>}, {pipeline_mode = #tpu.pipeline_mode<synchronous>, transform_indices = @transform_1, window_bounds = array<i64: 384, 32>}, {pipeline_mode = #tpu.pipeline_mode<synchronous>, transform_indices = @transform_2, window_bounds = array<i64: 48, 128>}, {pipeline_mode = #tpu.pipeline_mode<synchronous>, transform_indices = @transform_3, window_bounds = array<i64: 16, 16>}]} {
    %c0 = arith.constant 0 : index
    %c0_0 = arith.constant 0 : index
    %0 = vector.load %arg1[%c0, %c0_0] : memref<48x512xbf16, #tpu.memory_space<vmem>>, vector<48x512xbf16>
    %1 = vector.extract_strided_slice %0 {offsets = [0, 0], sizes = [16, 192], strides = [1, 1]} : vector<48x512xbf16> to vector<16x192xbf16>
    %2 = vector.extract_strided_slice %0 {offsets = [16, 0], sizes = [32, 96], strides = [1, 1]} : vector<48x512xbf16> to vector<32x96xbf16>
    %3 = vector.extract_strided_slice %0 {offsets = [16, 128], sizes = [32, 128], strides = [1, 1]} : vector<48x512xbf16> to vector<32x128xbf16>
    %4 = vector.extract_strided_slice %0 {offsets = [16, 256], sizes = [32, 32], strides = [1, 1]} : vector<48x512xbf16> to vector<32x32xbf16>
    %5 = vector.extract_strided_slice %0 {offsets = [16, 384], sizes = [32, 64], strides = [1, 1]} : vector<48x512xbf16> to vector<32x64xbf16>
    %c0_1 = arith.constant 0 : index
    %c0_2 = arith.constant 0 : index
    %6 = vector.load %arg2[%c0_1, %c0_2] : memref<384x32xbf16, #tpu.memory_space<vmem>>, vector<384x32xbf16>
    %7 = vector.extract_strided_slice %6 {offsets = [0, 0], sizes = [192, 32], strides = [1, 1]} : vector<384x32xbf16> to vector<192x32xbf16>
    %8 = vector.extract_strided_slice %6 {offsets = [192, 0], sizes = [128, 32], strides = [1, 1]} : vector<384x32xbf16> to vector<128x32xbf16>
    %9 = vector.extract_strided_slice %6 {offsets = [320, 0], sizes = [64, 16], strides = [1, 1]} : vector<384x32xbf16> to vector<64x16xbf16>
    %c0_3 = arith.constant 0 : index
    %c0_4 = arith.constant 0 : index
    %10 = vector.load %arg3[%c0_3, %c0_4] : memref<48x128xf32, #tpu.memory_space<vmem>>, vector<48x128xf32>
    %11 = vector.extract_strided_slice %10 {offsets = [0, 0], sizes = [16, 32], strides = [1, 1]} : vector<48x128xf32> to vector<16x32xf32>
    %12 = vector.extract_strided_slice %10 {offsets = [16, 0], sizes = [16, 16], strides = [1, 1]} : vector<48x128xf32> to vector<16x16xf32>
    %13 = vector.extract_strided_slice %10 {offsets = [32, 0], sizes = [1, 32], strides = [1, 1]} : vector<48x128xf32> to vector<1x32xf32>
    %14 = vector.extract_strided_slice %10 {offsets = [33, 0], sizes = [1, 32], strides = [1, 1]} : vector<48x128xf32> to vector<1x32xf32>
    %15 = vector.extract_strided_slice %10 {offsets = [34, 0], sizes = [1, 96], strides = [1, 1]} : vector<48x128xf32> to vector<1x96xf32>
    %16 = vector.extract_strided_slice %10 {offsets = [35, 0], sizes = [1, 32], strides = [1, 1]} : vector<48x128xf32> to vector<1x32xf32>
    %17 = vector.extract_strided_slice %10 {offsets = [36, 0], sizes = [1, 32], strides = [1, 1]} : vector<48x128xf32> to vector<1x32xf32>
    %18 = vector.extract_strided_slice %10 {offsets = [37, 0], sizes = [1, 32], strides = [1, 1]} : vector<48x128xf32> to vector<1x32xf32>
    %19 = vector.extract_strided_slice %10 {offsets = [38, 0], sizes = [1, 128], strides = [1, 1]} : vector<48x128xf32> to vector<1x128xf32>
    %20 = vector.extract_strided_slice %10 {offsets = [39, 0], sizes = [1, 32], strides = [1, 1]} : vector<48x128xf32> to vector<1x32xf32>
    %21 = vector.extract_strided_slice %10 {offsets = [40, 0], sizes = [1, 32], strides = [1, 1]} : vector<48x128xf32> to vector<1x32xf32>
    %22 = vector.extract_strided_slice %10 {offsets = [41, 0], sizes = [1, 32], strides = [1, 1]} : vector<48x128xf32> to vector<1x32xf32>
    %23 = vector.extract_strided_slice %10 {offsets = [42, 0], sizes = [1, 64], strides = [1, 1]} : vector<48x128xf32> to vector<1x64xf32>
    %24 = vector.extract_strided_slice %10 {offsets = [43, 0], sizes = [1, 16], strides = [1, 1]} : vector<48x128xf32> to vector<1x16xf32>
    %cst = arith.constant dense<0.000000e+00> : vector<16x32xf32>
    %25 = tpu.matmul %1, %7, %cst {dimension_numbers = #tpu.dot_dimension_numbers<[1], [0], [0], [1], [0, 0, 1, 1], [], []>} : vector<16x192xbf16>, vector<192x32xbf16>, vector<16x32xf32> -> vector<16x32xf32>
    %26 = arith.addf %25, %11 : vector<16x32xf32>
    %cst_5 = arith.constant dense<0.000000e+00> : vector<16xf32>
    %27 = vector.multi_reduction <add>, %26, %cst_5 [1] : vector<16x32xf32> to vector<16xf32>
    %28 = vector.shape_cast %27 : vector<16xf32> to vector<16x1xf32>
    %cst_6 = arith.constant 3.200000e+01 : f32
    %29 = vector.broadcast %cst_6 : f32 to vector<16x1xf32>
    %30 = arith.divf %28, %29 : vector<16x1xf32>
    %31 = arith.mulf %26, %26 : vector<16x32xf32>
    %cst_7 = arith.constant dense<0.000000e+00> : vector<16xf32>
    %32 = vector.multi_reduction <add>, %31, %cst_7 [1] : vector<16x32xf32> to vector<16xf32>
    %33 = vector.shape_cast %32 : vector<16xf32> to vector<16x1xf32>
    %cst_8 = arith.constant 3.200000e+01 : f32
    %34 = vector.broadcast %cst_8 : f32 to vector<16x1xf32>
    %35 = arith.divf %33, %34 : vector<16x1xf32>
    %36 = arith.mulf %30, %30 : vector<16x1xf32>
    %37 = arith.subf %35, %36 : vector<16x1xf32>
    %cst_9 = arith.constant 9.99999997E-7 : f32
    %38 = vector.broadcast %cst_9 : f32 to vector<16x1xf32>
    %39 = arith.addf %37, %38 : vector<16x1xf32>
    %40 = math.rsqrt %39 : vector<16x1xf32>
    %41 = vector.broadcast %40 : vector<16x1xf32> to vector<16x32xf32>
    %42 = vector.broadcast %13 : vector<1x32xf32> to vector<16x32xf32>
    %43 = arith.mulf %41, %42 : vector<16x32xf32>
    %44 = arith.mulf %26, %43 : vector<16x32xf32>
    %45 = vector.broadcast %30 : vector<16x1xf32> to vector<16x32xf32>
    %46 = arith.mulf %45, %43 : vector<16x32xf32>
    %47 = vector.broadcast %14 : vector<1x32xf32> to vector<16x32xf32>
    %48 = arith.subf %47, %46 : vector<16x32xf32>
    %49 = arith.addf %44, %48 : vector<16x32xf32>
    %50 = arith.truncf %49 : vector<16x32xf32> to vector<16x32xbf16>
    %cst_10 = arith.constant dense<0.000000e+00> : vector<16x96xf32>
    %51 = tpu.matmul %50, %2, %cst_10 {dimension_numbers = #tpu.dot_dimension_numbers<[1], [0], [0], [1], [0, 0, 1, 1], [], []>} : vector<16x32xbf16>, vector<32x96xbf16>, vector<16x96xf32> -> vector<16x96xf32>
    %52 = vector.broadcast %15 : vector<1x96xf32> to vector<16x96xf32>
    %53 = arith.addf %51, %52 : vector<16x96xf32>
    %54 = vector.extract_strided_slice %53 {offsets = [0, 0], sizes = [16, 16], strides = [1, 1]} : vector<16x96xf32> to vector<16x16xf32>
    %55 = arith.truncf %54 : vector<16x16xf32> to vector<16x16xbf16>
    %56 = vector.extract_strided_slice %53 {offsets = [0, 32], sizes = [16, 16], strides = [1, 1]} : vector<16x96xf32> to vector<16x16xf32>
    %57 = arith.truncf %56 : vector<16x16xf32> to vector<16x16xbf16>
    %58 = vector.extract_strided_slice %53 {offsets = [0, 64], sizes = [16, 16], strides = [1, 1]} : vector<16x96xf32> to vector<16x16xf32>
    %59 = arith.truncf %58 : vector<16x16xf32> to vector<16x16xbf16>
    %cst_11 = arith.constant dense<0.000000e+00> : vector<16x16xf32>
    %60 = tpu.matmul %55, %57, %cst_11 {dimension_numbers = #tpu.dot_dimension_numbers<[1], [1], [0], [0], [0, 0, 1, 0], [], []>} : vector<16x16xbf16>, vector<16x16xbf16>, vector<16x16xf32> -> vector<16x16xf32>
    %61 = arith.addf %60, %12 : vector<16x16xf32>
    %cst_12 = arith.constant dense<0xFF800000> : vector<16xf32>
    %62 = vector.multi_reduction <maximumf>, %61, %cst_12 [1] : vector<16x16xf32> to vector<16xf32>
    %63 = vector.shape_cast %62 : vector<16xf32> to vector<16x1xf32>
    %64 = vector.broadcast %63 : vector<16x1xf32> to vector<16x16xf32>
    %65 = arith.subf %61, %64 : vector<16x16xf32>
    %66 = math.exp %65 : vector<16x16xf32>
    %cst_13 = arith.constant dense<0.000000e+00> : vector<16xf32>
    %67 = vector.multi_reduction <add>, %66, %cst_13 [1] : vector<16x16xf32> to vector<16xf32>
    %68 = vector.shape_cast %67 : vector<16xf32> to vector<16x1xf32>
    %69 = tpu.reciprocal %68 {approx = true} : vector<16x1xf32> -> vector<16x1xf32>
    %70 = vector.broadcast %69 : vector<16x1xf32> to vector<16x16xf32>
    %71 = arith.mulf %66, %70 : vector<16x16xf32>
    %72 = arith.truncf %71 : vector<16x16xf32> to vector<16x16xbf16>
    %cst_14 = arith.constant dense<0.000000e+00> : vector<16x16xf32>
    %73 = tpu.matmul %72, %59, %cst_14 {dimension_numbers = #tpu.dot_dimension_numbers<[1], [0], [0], [1], [0, 0, 1, 1], [], []>} : vector<16x16xbf16>, vector<16x16xbf16>, vector<16x16xf32> -> vector<16x16xf32>
    %74 = vector.extract_strided_slice %53 {offsets = [0, 16], sizes = [16, 16], strides = [1, 1]} : vector<16x96xf32> to vector<16x16xf32>
    %75 = arith.truncf %74 : vector<16x16xf32> to vector<16x16xbf16>
    %76 = vector.extract_strided_slice %53 {offsets = [0, 48], sizes = [16, 16], strides = [1, 1]} : vector<16x96xf32> to vector<16x16xf32>
    %77 = arith.truncf %76 : vector<16x16xf32> to vector<16x16xbf16>
    %78 = vector.extract_strided_slice %53 {offsets = [0, 80], sizes = [16, 16], strides = [1, 1]} : vector<16x96xf32> to vector<16x16xf32>
    %79 = arith.truncf %78 : vector<16x16xf32> to vector<16x16xbf16>
    %cst_15 = arith.constant dense<0.000000e+00> : vector<16x16xf32>
    %80 = tpu.matmul %75, %77, %cst_15 {dimension_numbers = #tpu.dot_dimension_numbers<[1], [1], [0], [0], [0, 0, 1, 0], [], []>} : vector<16x16xbf16>, vector<16x16xbf16>, vector<16x16xf32> -> vector<16x16xf32>
    %81 = arith.addf %80, %12 : vector<16x16xf32>
    %cst_16 = arith.constant dense<0xFF800000> : vector<16xf32>
    %82 = vector.multi_reduction <maximumf>, %81, %cst_16 [1] : vector<16x16xf32> to vector<16xf32>
    %83 = vector.shape_cast %82 : vector<16xf32> to vector<16x1xf32>
    %84 = vector.broadcast %83 : vector<16x1xf32> to vector<16x16xf32>
    %85 = arith.subf %81, %84 : vector<16x16xf32>
    %86 = math.exp %85 : vector<16x16xf32>
    %cst_17 = arith.constant dense<0.000000e+00> : vector<16xf32>
    %87 = vector.multi_reduction <add>, %86, %cst_17 [1] : vector<16x16xf32> to vector<16xf32>
    %88 = vector.shape_cast %87 : vector<16xf32> to vector<16x1xf32>
    %89 = tpu.reciprocal %88 {approx = true} : vector<16x1xf32> -> vector<16x1xf32>
    %90 = vector.broadcast %89 : vector<16x1xf32> to vector<16x16xf32>
    %91 = arith.mulf %86, %90 : vector<16x16xf32>
    %92 = arith.truncf %91 : vector<16x16xf32> to vector<16x16xbf16>
    %cst_18 = arith.constant dense<0.000000e+00> : vector<16x16xf32>
    %93 = tpu.matmul %92, %79, %cst_18 {dimension_numbers = #tpu.dot_dimension_numbers<[1], [0], [0], [1], [0, 0, 1, 1], [], []>} : vector<16x16xbf16>, vector<16x16xbf16>, vector<16x16xf32> -> vector<16x16xf32>
    %94 = tpu.concatenate %73, %93 in 1 : vector<16x16xf32>, vector<16x16xf32> -> vector<16x32xf32>
    %95 = arith.truncf %94 : vector<16x32xf32> to vector<16x32xbf16>
    %cst_19 = arith.constant dense<0.000000e+00> : vector<16x32xf32>
    %96 = tpu.matmul %95, %4, %cst_19 {dimension_numbers = #tpu.dot_dimension_numbers<[1], [0], [0], [1], [0, 0, 1, 1], [], []>} : vector<16x32xbf16>, vector<32x32xbf16>, vector<16x32xf32> -> vector<16x32xf32>
    %97 = arith.addf %26, %96 : vector<16x32xf32>
    %98 = vector.broadcast %16 : vector<1x32xf32> to vector<16x32xf32>
    %99 = arith.addf %97, %98 : vector<16x32xf32>
    %cst_20 = arith.constant dense<0.000000e+00> : vector<16xf32>
    %100 = vector.multi_reduction <add>, %99, %cst_20 [1] : vector<16x32xf32> to vector<16xf32>
    %101 = vector.shape_cast %100 : vector<16xf32> to vector<16x1xf32>
    %cst_21 = arith.constant 3.200000e+01 : f32
    %102 = vector.broadcast %cst_21 : f32 to vector<16x1xf32>
    %103 = arith.divf %101, %102 : vector<16x1xf32>
    %104 = arith.mulf %99, %99 : vector<16x32xf32>
    %cst_22 = arith.constant dense<0.000000e+00> : vector<16xf32>
    %105 = vector.multi_reduction <add>, %104, %cst_22 [1] : vector<16x32xf32> to vector<16xf32>
    %106 = vector.shape_cast %105 : vector<16xf32> to vector<16x1xf32>
    %cst_23 = arith.constant 3.200000e+01 : f32
    %107 = vector.broadcast %cst_23 : f32 to vector<16x1xf32>
    %108 = arith.divf %106, %107 : vector<16x1xf32>
    %109 = arith.mulf %103, %103 : vector<16x1xf32>
    %110 = arith.subf %108, %109 : vector<16x1xf32>
    %cst_24 = arith.constant 9.99999997E-7 : f32
    %111 = vector.broadcast %cst_24 : f32 to vector<16x1xf32>
    %112 = arith.addf %110, %111 : vector<16x1xf32>
    %113 = math.rsqrt %112 : vector<16x1xf32>
    %114 = vector.broadcast %113 : vector<16x1xf32> to vector<16x32xf32>
    %115 = vector.broadcast %17 : vector<1x32xf32> to vector<16x32xf32>
    %116 = arith.mulf %114, %115 : vector<16x32xf32>
    %117 = arith.mulf %99, %116 : vector<16x32xf32>
    %118 = vector.broadcast %103 : vector<16x1xf32> to vector<16x32xf32>
    %119 = arith.mulf %118, %116 : vector<16x32xf32>
    %120 = vector.broadcast %18 : vector<1x32xf32> to vector<16x32xf32>
    %121 = arith.subf %120, %119 : vector<16x32xf32>
    %122 = arith.addf %117, %121 : vector<16x32xf32>
    %123 = arith.truncf %122 : vector<16x32xf32> to vector<16x32xbf16>
    %cst_25 = arith.constant dense<0.000000e+00> : vector<16x128xf32>
    %124 = tpu.matmul %123, %3, %cst_25 {dimension_numbers = #tpu.dot_dimension_numbers<[1], [0], [0], [1], [0, 0, 1, 1], [], []>} : vector<16x32xbf16>, vector<32x128xbf16>, vector<16x128xf32> -> vector<16x128xf32>
    %125 = vector.broadcast %19 : vector<1x128xf32> to vector<16x128xf32>
    %126 = arith.addf %124, %125 : vector<16x128xf32>
    %cst_26 = arith.constant 5.000000e-01 : f32
    %127 = vector.broadcast %cst_26 : f32 to vector<16x128xf32>
    %128 = arith.mulf %127, %126 : vector<16x128xf32>
    %cst_27 = arith.constant 4.471500e-02 : f32
    %129 = vector.broadcast %cst_27 : f32 to vector<16x128xf32>
    %130 = arith.mulf %129, %126 : vector<16x128xf32>
    %131 = arith.mulf %130, %126 : vector<16x128xf32>
    %132 = arith.mulf %131, %126 : vector<16x128xf32>
    %133 = arith.addf %126, %132 : vector<16x128xf32>
    %cst_28 = arith.constant 0.797884583 : f32
    %134 = vector.broadcast %cst_28 : f32 to vector<16x128xf32>
    %135 = arith.mulf %134, %133 : vector<16x128xf32>
    %136 = math.tanh %135 : vector<16x128xf32>
    %cst_29 = arith.constant 1.000000e+00 : f32
    %137 = vector.broadcast %cst_29 : f32 to vector<16x128xf32>
    %138 = arith.addf %137, %136 : vector<16x128xf32>
    %139 = arith.mulf %128, %138 : vector<16x128xf32>
    %140 = arith.truncf %139 : vector<16x128xf32> to vector<16x128xbf16>
    %cst_30 = arith.constant dense<0.000000e+00> : vector<16x32xf32>
    %141 = tpu.matmul %140, %8, %cst_30 {dimension_numbers = #tpu.dot_dimension_numbers<[1], [0], [0], [1], [0, 0, 1, 1], [], []>} : vector<16x128xbf16>, vector<128x32xbf16>, vector<16x32xf32> -> vector<16x32xf32>
    %142 = arith.addf %99, %141 : vector<16x32xf32>
    %143 = vector.broadcast %20 : vector<1x32xf32> to vector<16x32xf32>
    %144 = arith.addf %142, %143 : vector<16x32xf32>
    %cst_31 = arith.constant dense<0.000000e+00> : vector<16xf32>
    %145 = vector.multi_reduction <add>, %144, %cst_31 [1] : vector<16x32xf32> to vector<16xf32>
    %146 = vector.shape_cast %145 : vector<16xf32> to vector<16x1xf32>
    %cst_32 = arith.constant 3.200000e+01 : f32
    %147 = vector.broadcast %cst_32 : f32 to vector<16x1xf32>
    %148 = arith.divf %146, %147 : vector<16x1xf32>
    %149 = arith.mulf %144, %144 : vector<16x32xf32>
    %cst_33 = arith.constant dense<0.000000e+00> : vector<16xf32>
    %150 = vector.multi_reduction <add>, %149, %cst_33 [1] : vector<16x32xf32> to vector<16xf32>
    %151 = vector.shape_cast %150 : vector<16xf32> to vector<16x1xf32>
    %cst_34 = arith.constant 3.200000e+01 : f32
    %152 = vector.broadcast %cst_34 : f32 to vector<16x1xf32>
    %153 = arith.divf %151, %152 : vector<16x1xf32>
    %154 = arith.mulf %148, %148 : vector<16x1xf32>
    %155 = arith.subf %153, %154 : vector<16x1xf32>
    %cst_35 = arith.constant 9.99999997E-7 : f32
    %156 = vector.broadcast %cst_35 : f32 to vector<16x1xf32>
    %157 = arith.addf %155, %156 : vector<16x1xf32>
    %158 = math.rsqrt %157 : vector<16x1xf32>
    %159 = vector.broadcast %158 : vector<16x1xf32> to vector<16x32xf32>
    %160 = vector.broadcast %21 : vector<1x32xf32> to vector<16x32xf32>
    %161 = arith.mulf %159, %160 : vector<16x32xf32>
    %162 = arith.mulf %144, %161 : vector<16x32xf32>
    %163 = vector.broadcast %148 : vector<16x1xf32> to vector<16x32xf32>
    %164 = arith.mulf %163, %161 : vector<16x32xf32>
    %165 = vector.broadcast %22 : vector<1x32xf32> to vector<16x32xf32>
    %166 = arith.subf %165, %164 : vector<16x32xf32>
    %167 = arith.addf %162, %166 : vector<16x32xf32>
    %168 = arith.truncf %167 : vector<16x32xf32> to vector<16x32xbf16>
    %cst_36 = arith.constant dense<0.000000e+00> : vector<16x64xf32>
    %169 = tpu.matmul %168, %5, %cst_36 {dimension_numbers = #tpu.dot_dimension_numbers<[1], [0], [0], [1], [0, 0, 1, 1], [], []>} : vector<16x32xbf16>, vector<32x64xbf16>, vector<16x64xf32> -> vector<16x64xf32>
    %170 = vector.broadcast %23 : vector<1x64xf32> to vector<16x64xf32>
    %171 = arith.addf %169, %170 : vector<16x64xf32>
    %cst_37 = arith.constant 5.000000e-01 : f32
    %172 = vector.broadcast %cst_37 : f32 to vector<16x64xf32>
    %173 = arith.mulf %172, %171 : vector<16x64xf32>
    %cst_38 = arith.constant 4.471500e-02 : f32
    %174 = vector.broadcast %cst_38 : f32 to vector<16x64xf32>
    %175 = arith.mulf %174, %171 : vector<16x64xf32>
    %176 = arith.mulf %175, %171 : vector<16x64xf32>
    %177 = arith.mulf %176, %171 : vector<16x64xf32>
    %178 = arith.addf %171, %177 : vector<16x64xf32>
    %cst_39 = arith.constant 0.797884583 : f32
    %179 = vector.broadcast %cst_39 : f32 to vector<16x64xf32>
    %180 = arith.mulf %179, %178 : vector<16x64xf32>
    %181 = math.tanh %180 : vector<16x64xf32>
    %cst_40 = arith.constant 1.000000e+00 : f32
    %182 = vector.broadcast %cst_40 : f32 to vector<16x64xf32>
    %183 = arith.addf %182, %181 : vector<16x64xf32>
    %184 = arith.mulf %173, %183 : vector<16x64xf32>
    %185 = arith.truncf %184 : vector<16x64xf32> to vector<16x64xbf16>
    %cst_41 = arith.constant dense<0.000000e+00> : vector<16x16xf32>
    %186 = tpu.matmul %185, %9, %cst_41 {dimension_numbers = #tpu.dot_dimension_numbers<[1], [0], [0], [1], [0, 0, 1, 1], [], []>} : vector<16x64xbf16>, vector<64x16xbf16>, vector<16x16xf32> -> vector<16x16xf32>
    %187 = vector.broadcast %24 : vector<1x16xf32> to vector<16x16xf32>
    %188 = arith.addf %186, %187 : vector<16x16xf32>
    %c0_42 = arith.constant 0 : index
    %c0_43 = arith.constant 0 : index
    %189 = vector.load %arg4[%c0_42, %c0_43] : memref<16x16xf32, #tpu.memory_space<vmem>>, vector<16x16xf32>
    tpu.vector_store %arg4[%c0_42, %c0_43], %188 {strides = array<i32>} : memref<16x16xf32, #tpu.memory_space<vmem>>, vector<16x16xf32>,
    return
  }
  func.func @transform_0(%arg0: i32) -> (i32, i32) {
    %c0_i32 = arith.constant 0 : i32
    %c0_i32_0 = arith.constant 0 : i32
    %c0_i32_1 = arith.constant 0 : i32
    return %c0_i32, %c0_i32_0 : i32, i32
  }
  func.func @transform_1(%arg0: i32) -> (i32, i32) {
    %c0_i32 = arith.constant 0 : i32
    %c0_i32_0 = arith.constant 0 : i32
    %c0_i32_1 = arith.constant 0 : i32
    return %c0_i32, %c0_i32_0 : i32, i32
  }
  func.func @transform_2(%arg0: i32) -> (i32, i32) {
    %c0_i32 = arith.constant 0 : i32
    %c0_i32_0 = arith.constant 0 : i32
    %c0_i32_1 = arith.constant 0 : i32
    return %c0_i32, %c0_i32_0 : i32, i32
  }
  func.func @transform_3(%arg0: i32) -> (i32, i32) {
    %c0_i32 = arith.constant 0 : i32
    %c0_i32_0 = arith.constant 0 : i32
    %c0_i32_1 = arith.constant 0 : i32
    return %c0_i32, %c0_i32_0 : i32, i32
  }
}

</mosaic_0001>

<bundles_post_ra>
// kernel: dinov2_forward.1
= control target key start
LH: loop header
LB: loop body
LE: loop exit
PB: predicated region body
PF: predicated region fallthrough
CT: control target
= control target key end

     0   :  { %vm160_vm0 = vcmask 523264   ;;  %vm192_vm1 = vcmask 261120   ;;  %v1016_v34 = vmov 32.0   ;;  %s1017_s4 = smov 112   ;;  %s1018_s5 = smov 96   ;;  %vm291_vm9 = vcmask 130048   ;;  %s1307_s1 = inlined_call_operand.vmem [shape: bf16[384,32], index: 1, kind: input, shape index: {}]   ;;  %s1308_s0 = inlined_call_operand.vmem [shape: bf16[48,512], index: 0, kind: input, shape index: {}]   ;;  %s1309_s2 = inlined_call_operand.vmem [shape: f32[48,128], index: 2, kind: input, shape index: {}]   ;;  %s1310_s3 = inlined_call_operand.vmem [shape: f32[16,16], index: 3, kind: output, shape index: {}]  }
   0x1   :  { %v949_v0 = vld [vmem:[%s1307_s1 + $0x38] sm:$0xff]  ;;  %v948_v2 = vld [vmem:[%s1307_s1 + $0x30] sm:$0xff]  ;;  %v947_v4 = vld [vmem:[%s1307_s1 + $0x28] sm:$0xff]  ;;  %978 = vrcp.f32 %v1016_v34  ;;  %s1019_s6 = smov 80   ;;  %s1020_s11 = smov 48  }
   0x2   :  { %v953_v1 = vld [vmem:[%s1307_s1 + $0x58] sm:$0xff]  ;;  %164 = vmatpush.bf16.msra.mxu0 %v949_v0  ;;  %v952_v3 = vld [vmem:[%s1307_s1 + $0x50] sm:$0xff]  ;;  %v951_v5 = vld [vmem:[%s1307_s1 + $0x48] sm:$0xff]  ;;  %s1021_s12 = smov 64   ;;  %s1022_s21 = smov 16  }
   0x3   :  { %182 = vmatpush.bf16.msra.mxu1 %v953_v1  ;;  %v946_v6 = vld [vmem:[%s1307_s1 + $0x20] sm:$0xff]  ;;  %v790_v9 = vld [vmem:[%s1308_s0 + $0x10] sm:$0xf0]  ;;  %v945_v10 = vld [vmem:[%s1307_s1 + $0x18] sm:$0xff] }
   0x4   :  { %v950_v7 = vld [vmem:[%s1307_s1 + $0x40] sm:$0xff]  ;;  %v944_v12 = vld [vmem:[%s1307_s1 + $0x10] sm:$0xff]  ;;  %v943_v13 = vld [vmem:[%s1307_s1 + $0x8] sm:$0xff] }
   0x5   :  { %v932_v8 = vld [vmem:[%s1308_s0 + $0x4] sm:$0xf]  ;;  %v788_v15 = vld [vmem:[%s1308_s0] sm:$0xf]  ;;  %v933_v16 = vld [vmem:[%s1308_s0 + $0xc] sm:$0xf0] }
   0x6   :  { %165 = vmatpush.bf16.msra.mxu0 %v948_v2  ;;  %v793_v11 = vor.u32 %v932_v8, %v790_v9  ;;  %v942_v14 = vld [vmem:[%s1307_s1] sm:$0xff]  ;;  %v789_v17 = vor.u32 %v933_v16, %v788_v15  ;;  %v74_v25 = vld [vmem:[%s1309_s2 + $0x8] sm:$0xff]  ;;  %v940_v45 = vld [vmem:[%s1308_s0 + $0x4c] sm:$0xf0] }
   0x7   :  { %183 = vmatpush.bf16.msra.mxu1 %v952_v3  ;;  %v73_v18 = vld [vmem:[%s1309_s2] sm:$0xff]  ;;  %v979_v35 = vpop.eup %978  ;;  %v936_v50 = vld [vmem:[%s1308_s0 + $0x2c] sm:$0xf0] }
   0x8   :  { %v200_v36 = vmul.f32 32.0, %v979_v35  ;;  %vm204_vm2 = vweird.f32 %v979_v35  ;;  %v849_v44 = vld [vmem:[%s1308_s0 + $0x40] sm:$0xf] }
   0x9   :  { %v845_v46 = vld [vmem:[%s1308_s0 + $0x20] sm:$0xf]  ;;  %v850_v49 = vor.u32 %v940_v45, %v849_v44 }
   0xa   :  { %166 = vmatpush.bf16.msra.mxu0 %v947_v4  ;;  %v201_v37 = vsub.f32 1.0, %v200_v36  ;;  %v846_v52 = vor.u32 %v936_v50, %v845_v46  ;;  %v1133_v1 = vld [vmem:[%s1309_s2 + $0x20] sm:$0xff]  ;;  %v76_v46 = vld [vmem:[%s1309_s2 + $0x18] sm:$0xff] }
   0xb   :  { %184 = vmatpush.bf16.msra.mxu1 %v951_v5  ;;  %279 = vmatpush.bf16.msra.mxu2 %v850_v49 }
   0xc   :  { %v202_v38 = vmul.f32 %v979_v35, %v201_v37 }
   0xe   :  { %167 = vmatpush.bf16.msra.mxu0 %v946_v6  ;;  %v203_v39 = vadd.f32 %v979_v35, %v202_v38  ;;  %v244_v6 = vperm.slane %v1133_v1, 0 }
   0xf   :  { %185 = vmatpush.bf16.msra.mxu1 %v950_v7  ;;  %280 = vmatpush.bf16.msra.mxu2 %v846_v52 }
  0x10   :  { %v1112_v40 = vsel %vm204_vm2, %v979_v35, %v203_v39 }
  0x12   :  { %168 = vmatpush.bf16.msra.mxu0 %v945_v10  ;;  %842 = vmatmul.msk.bf16.vlgmr.msra.gmra.mxu1 %vm160_vm0, %v793_v11 }
  0x16   :  { %169 = vmatpush.bf16.msra.mxu0 %v944_v12 }
  0x1a   :  { %170 = vmatpush.bf16.msra.mxu0 %v943_v13 }
  0x1e   :  { %171 = vmatpush.bf16.msra.mxu0 %v942_v14  ;;  %v251_v14 = vperm.slane %v1133_v1, 1 }
  0x21   :  { %172 = vmatmul.bf16.vlgmr.msra.gmra.mxu0 %v789_v17 }
  0x8f   :  { %v187_v19 = vpop.f32.mrf.mxu1 }
  0x97   :  { %v189_v29 = vpop.f32.mrf.mxu1 }
  0x9e   :  { %v173_v20 = vpop.f32.mrf.mxu0 }
  0x9f   :  { %v174_v21 = vadd.f32 %v173_v20, %v73_v18 }
  0xa1   :  { %v1095_v22 = vadd.f32 %v187_v19, %v174_v21 }
  0xa3   :  { %v193_v23 = vsel %vm192_vm1, %v1095_v22, 0.0  ;;  %v208_v24 = vmul.f32 %v1095_v22, %v1095_v22 }
  0xa4   :  { %194 = vadd.xlane.f32.xlu0 %v193_v23 }
  0xa5   :  { %v210_v26 = vsel %vm192_vm1, %v208_v24, 0.0 }
  0xa6   :  { %v175_v27 = vpop.f32.mrf.mxu0  ;;  %211 = vadd.xlane.f32.xlu1 %v210_v26 }
  0xa7   :  { %v176_v28 = vadd.f32 %v175_v27, %v74_v25  ;;  %v257_v27 = vperm.slane %v1133_v1, 2 }
  0xa9   :  { %v1105_v30 = vadd.f32 %v189_v29, %v176_v28 }
  0xab   :  { %v196_v31 = vsel %vm192_vm1, %v1105_v30, 0.0  ;;  %v209_v32 = vmul.f32 %v1105_v30, %v1105_v30 }
  0xac   :  { %197 = vadd.xlane.f32.xlu0 %v196_v31 }
  0xad   :  { %v213_v33 = vsel %vm192_vm1, %v209_v32, 0.0 }
  0xae   :  { %214 = vadd.xlane.f32.xlu1 %v213_v33 }
 0x117   :  { %v195_v41 = vpop.xlane.xlu0 %194 }
 0x118   :  { %v206_v42 = vmul.f32 %v1112_v40, %v195_v41  ;;  %v75_v41 = vld [vmem:[%s1309_s2 + $0x10] sm:$0xff] }
 0x119   :  { %v212_v43 = vpop.xlane.xlu1 %211 }
 0x11a   :  { %v218_v47 = vmul.f32 %v206_v42, %v206_v42  ;;  %v216_v48 = vmul.f32 %v212_v43, %v1112_v40 }
 0x11c   :  { %v220_v51 = vsub.f32 %v216_v48, %v218_v47 }
 0x11e   :  { %v222_v53 = vadd.f32 1e-06, %v220_v51 }
 0x11f   :  { %v198_v54 = vpop.xlane.xlu0 %197 }
 0x120   :  { %980 = vrsqrt.f32 %v222_v53  ;;  %v207_v55 = vmul.f32 %v1112_v40, %v198_v54  ;;  %vm230_vm4 = vweird.f32 %v222_v53 }
 0x121   :  { %v215_v56 = vpop.xlane.xlu1 %214 }
 0x122   :  { %v219_v57 = vmul.f32 %v207_v55, %v207_v55  ;;  %v217_v58 = vmul.f32 %v215_v56, %v1112_v40 }
 0x124   :  { %v221_v59 = vsub.f32 %v217_v58, %v219_v57 }
 0x126   :  { %v981_v60 = vpop.eup %980  ;;  %v223_v61 = vadd.f32 1e-06, %v221_v59 }
 0x127   :  { %v225_v62 = vmul.f32 %v981_v60, %v222_v53  ;;  %vm231_vm3 = vweird.f32 %v981_v60 }
 0x128   :  { %982 = vrsqrt.f32 %v223_v61  ;;  %vm232_vm5 = vmor %vm230_vm4, %vm231_vm3  ;;  %vm240_vm7 = vweird.f32 %v223_v61 }
 0x129   :  { %v226_v63 = vmul.f32 %v981_v60, %v225_v62 }
 0x12b   :  { %v227_v0 = vmul.f32 0.5, %v226_v63 }
 0x12d   :  { %v228_v2 = vsub.f32 1.5, %v227_v0 }
 0x12e   :  { %v983_v3 = vpop.eup %982 }
 0x12f   :  { %v229_v4 = vmul.f32 %v981_v60, %v228_v2  ;;  %v235_v5 = vmul.f32 %v983_v3, %v223_v61  ;;  %vm241_vm6 = vweird.f32 %v983_v3 }
 0x130   :  { %vm242_vm8 = vmor %vm240_vm7, %vm241_vm6 }
 0x131   :  { %v233_v7 = vsel %vm232_vm5, %v981_v60, %v229_v4  ;;  %v236_v8 = vmul.f32 %v983_v3, %v235_v5 }
 0x132   :  { %v245_v10 = vmul.f32 %v244_v6, %v233_v7 }
 0x133   :  { %v237_v9 = vmul.f32 0.5, %v236_v8 }
 0x134   :  { %v249_v13 = vmul.f32 %v245_v10, %v206_v42  ;;  %v247_v19 = vmul.f32 %v245_v10, %v1095_v22 }
 0x135   :  { %v238_v11 = vsub.f32 1.5, %v237_v9 }
 0x136   :  { %v252_v18 = vsub.f32 %v251_v14, %v249_v13 }
 0x137   :  { %v239_v12 = vmul.f32 %v983_v3, %v238_v11 }
 0x138   :  { %v254_v23 = vadd.f32 %v252_v18, %v247_v19 }
 0x139   :  { %v243_v15 = vsel %vm242_vm8, %v983_v3, %v239_v12 }
 0x13a   :  { %v246_v16 = vmul.f32 %v244_v6, %v243_v15 }
 0x13c   :  { %v250_v17 = vmul.f32 %v246_v16, %v207_v55  ;;  %v248_v20 = vmul.f32 %v246_v16, %v1105_v30 }
 0x13e   :  { %v253_v21 = vsub.f32 %v251_v14, %v250_v17 }
 0x140   :  { %v255_v24 = vadd.f32 %v253_v21, %v248_v20 }
 0x142   :  { %v256_v25 = vpack.c.bf16 %v255_v24, %v254_v23 }
 0x144   :  { %851 = vmatmul.msk.bf16.vlgmr.msra.gmra.mxu2 %vm192_vm1, %v256_v25 }
 0x1c7   :  { %v282_v26 = vpop.f32.mrf.mxu2 }
 0x1c8   :  { %v283_v29 = vadd.f32 %v282_v26, %v257_v27 }
 0x1cf   :  { %v284_v28 = vpop.f32.mrf.mxu2 }
 0x1d0   :  { %v285_v31 = vadd.f32 %v284_v28, %v257_v27  ;;  %v862_v27 = vld [vmem:[%s1308_s0 + $0x48] sm:$0xf]  ;;  %v941_v28 = vld [vmem:[%s1308_s0 + $0x54] sm:$0xf0] }
 0x1d2   :  { %v1141_v32 = vpack.c.bf16 %v285_v31, %v283_v29  ;;  %v858_v29 = vld [vmem:[%s1308_s0 + $0x28] sm:$0xf]  ;;  %v863_v31 = vor.u32 %v941_v28, %v862_v27 }
 0x1d4   :  { %355 = vrot.lane.b32.xlu0 %v1141_v32, %s1017_s4  ;;  %289 = vrot.lane.b32.xlu2 %v1141_v32, %s1018_s5 }
 0x1dc   :  { %357 = vrot.lane.b32.xlu2 %v1141_v32, %s1019_s6 }
 0x22e   :  { %v290_v33 = vpop.permute.xlu2 %289 }
 0x22f   :  { %v296_v34 = vsel %vm291_vm9, %v290_v33, 0 }
 0x230   :  { %305 = vmatpush.bf16.xpose.msra.mxu3 %v296_v34 }
 0x236   :  { %v358_v35 = vpop.permute.xlu2 %357 }
 0x237   :  { %852 = vmatmul.msk.bf16.vlgmr.msra.gmra.mxu3 %vm291_vm9, %v1141_v32  ;;  %v363_v36 = vsel %vm291_vm9, %v358_v35, 0 }
 0x238   :  { %372 = vmatpush.bf16.xpose.msrb.mxu3 %v363_v36 }
 0x246   :  { %v356_v37 = vpop.permute.xlu0 %355 }
 0x247   :  { %854 = vmatmul.msk.bf16.vlgmr.msrb.gmra.mxu3 %vm291_vm9, %v356_v37 }
 0x2ba   :  { %v307_v38 = vpop.f32.mrf.mxu3 }
 0x2bb   :  { %v308_v45 = vadd.f32 %v307_v38, %v75_v41 }
 0x2bd   :  { %v312_v50 = vsel %vm291_vm9, %v308_v45, -inf }
 0x2c2   :  { %v309_v39 = vpop.f32.mrf.mxu3 }
 0x2c3   :  { %v310_v51 = vadd.f32 %v309_v39, %v76_v46 }
 0x2c5   :  { %v315_v52 = vsel %vm291_vm9, %v310_v51, -inf }
 0x2ca   :  { %v374_v42 = vpop.f32.mrf.mxu3 }
 0x2cb   :  { %v375_v43 = vadd.f32 %v374_v42, %v75_v41 }
 0x2cd   :  { %v379_v44 = vsel %vm291_vm9, %v375_v43, -inf }
 0x2ce   :  { %380 = vmax.xlane.f32.xlu1 %v379_v44 }
 0x2d2   :  { %v376_v47 = vpop.f32.mrf.mxu3 }
 0x2d3   :  { %v377_v48 = vadd.f32 %v376_v47, %v76_v46  ;;  %v464_v46 = vperm.slane %v1133_v1, 3 }
 0x2d5   :  { %v382_v49 = vsel %vm291_vm9, %v377_v48, -inf }
 0x2d6   :  { %383 = vmax.xlane.f32.xlu2 %v382_v49  ;;  %313 = vmax.xlane.f32.xlu1 %v312_v50 }
 0x2de   :  { %316 = vmax.xlane.f32.xlu1 %v315_v52 }
 0x2f7   :  { %402 = vrot.lane.b32.xlu1 %v1141_v32, %s1020_s11 }
 0x341   :  { %v381_v53 = vpop.xlane.xlu1 %380 }
 0x342   :  { %v385_v54 = vsub.f32 %v375_v43, %v381_v53 }
 0x344   :  { %v387_v55 = vmul.f32 1.442695, %v385_v54 }
 0x346   :  { %984 = vpow2.f32 %v387_v55 }
 0x349   :  { %v384_v56 = vpop.xlane.xlu2 %383  ;;  %v314_v57 = vpop.xlane.xlu1 %313 }
 0x34a   :  { %v386_v58 = vsub.f32 %v377_v48, %v384_v56  ;;  %v318_v59 = vsub.f32 %v308_v45, %v314_v57 }
 0x34c   :  { %v985_v60 = vpop.eup %984  ;;  %v389_v61 = vmul.f32 1.442695, %v386_v58  ;;  %v320_v62 = vmul.f32 1.442695, %v318_v59 }
 0x34d   :  { %v391_v63 = vsel %vm291_vm9, %v985_v60, 0.0 }
 0x34e   :  { %986 = vpow2.f32 %v389_v61  ;;  %392 = vadd.xlane.f32.xlu0 %v391_v63  ;;  %v938_v63 = vld [vmem:[%s1308_s0 + $0x44] sm:$0xf] }
 0x34f   :  { %988 = vpow2.f32 %v320_v62 }
 0x351   :  { %v317_v0 = vpop.xlane.xlu1 %316 }
 0x352   :  { %v319_v2 = vsub.f32 %v310_v51, %v317_v0  ;;  %v869_v0 = vld [vmem:[%s1308_s0 + $0x50] sm:$0xf0] }
 0x354   :  { %v987_v3 = vpop.eup %986  ;;  %v322_v4 = vmul.f32 1.442695, %v319_v2 }
 0x355   :  { %v989_v5 = vpop.eup %988  ;;  %v394_v6 = vsel %vm291_vm9, %v987_v3, 0.0 }
 0x356   :  { %990 = vpow2.f32 %v322_v4  ;;  %395 = vadd.xlane.f32.xlu1 %v394_v6  ;;  %v324_v7 = vsel %vm291_vm9, %v989_v5, 0.0  ;;  %v934_v6 = vld [vmem:[%s1308_s0 + $0x24] sm:$0xf] }
 0x357   :  { %325 = vadd.xlane.f32.xlu2 %v324_v7  ;;  %v865_v7 = vld [vmem:[%s1308_s0 + $0x30] sm:$0xf0] }
 0x35c   :  { %v991_v8 = vpop.eup %990 }
 0x35d   :  { %v327_v9 = vsel %vm291_vm9, %v991_v8, 0.0 }
 0x35f   :  { %328 = vadd.xlane.f32.xlu2 %v327_v9 }
 0x369   :  { %v403_v10 = vpop.permute.xlu1 %402 }
 0x36a   :  { %415 = vmatpush.bf16.msrb.mxu1 %v403_v10 }
 0x36f   :  { %335 = vrot.lane.b32.xlu1 %v1141_v32, %s1021_s12  ;;  %v937_v32 = vld [vmem:[%s1308_s0 + $0x34] sm:$0xf0] }
 0x370   :  { %v859_v34 = vor.u32 %v937_v32, %v858_v29 }
 0x3c1   :  { %v393_v11 = vpop.xlane.xlu0 %392 }
 0x3c2   :  { %992 = vrcp.f32 %v393_v11 }
 0x3c8   :  { %v993_v14 = vpop.eup %992 }
 0x3c9   :  { %v396_v12 = vpop.xlane.xlu1 %395  ;;  %v399_v16 = vmul.f32 %v993_v14, %v985_v60 }
 0x3ca   :  { %v326_v13 = vpop.xlane.xlu2 %325  ;;  %994 = vrcp.f32 %v396_v12 }
 0x3d0   :  { %v995_v15 = vpop.eup %994 }
 0x3d1   :  { %v400_v17 = vmul.f32 %v995_v15, %v987_v3  ;;  %v872_v3 = vor.u32 %v938_v63, %v869_v0 }
 0x3d2   :  { %v329_v18 = vpop.xlane.xlu2 %328 }
 0x3d3   :  { %v401_v19 = vpack.c.bf16 %v400_v17, %v399_v16  ;;  %996 = vrcp.f32 %v329_v18  ;;  %542 = vmatpush.bf16.msra.mxu3 %v872_v3 }
 0x3d4   :  { %998 = vrcp.f32 %v326_v13 }
 0x3d5   :  { %855 = vmatmul.msk.bf16.vlgmr.msrb.gmra.mxu1 %vm291_vm9, %v401_v19 }
 0x3d9   :  { %v997_v20 = vpop.eup %996 }
 0x3da   :  { %v999_v21 = vpop.eup %998  ;;  %v333_v23 = vmul.f32 %v997_v20, %v991_v8  ;;  %v868_v8 = vor.u32 %v934_v6, %v865_v7 }
 0x3db   :  { %v332_v24 = vmul.f32 %v999_v21, %v989_v5 }
 0x3dc   :  { %543 = vmatpush.bf16.msra.mxu3 %v868_v8 }
 0x3dd   :  { %v334_v26 = vpack.c.bf16 %v333_v23, %v332_v24  ;;  %v511_v23 = vperm.slane %v1133_v1, 4 }
 0x3e1   :  { %v336_v25 = vpop.permute.xlu1 %335 }
 0x3e2   :  { %348 = vmatpush.bf16.msrb.mxu2 %v336_v25 }
 0x3e5   :  { %853 = vmatmul.msk.bf16.vlgmr.msrb.gmra.mxu2 %vm291_vm9, %v334_v26 }
 0x3e6   :  { %454 = vmatpush.bf16.msra.mxu2 %v863_v31  ;;  %v518_v31 = vperm.slane %v1133_v1, 5 }
 0x3ea   :  { %455 = vmatpush.bf16.msra.mxu2 %v859_v34 }
 0x452   :  { %v417_v33 = vpop.f32.mrf.mxu1 }
 0x45a   :  { %v419_v35 = vpop.f32.mrf.mxu1 }
 0x45b   :  { %v973_v36 = vpack.i.bf16 %v419_v35, %v417_v33 }
 0x45d   :  { %974 = vrot.lane.b32.xlu2 %v973_v36, %s1022_s21 }
 0x468   :  { %v350_v37 = vpop.f32.mrf.mxu2 }
 0x470   :  { %v352_v42 = vpop.f32.mrf.mxu2 }
 0x4b7   :  { %v975_v38 = vpop.permute.xlu2 %974 }
 0x4b8   :  { %v977_v39 = vunpack.i.h.bf16 %v975_v38  ;;  %v976_v41 = vunpack.i.l.bf16 %v975_v38 }
 0x4ba   :  { %v430_v43 = vsel %vm291_vm9, %v350_v37, %v976_v41  ;;  %v431_v44 = vsel %vm291_vm9, %v352_v42, %v977_v39 }
 0x4bb   :  { %v432_v45 = vpack.c.bf16 %v431_v44, %v430_v43  ;;  %v961_v44 = vld [vmem:[%s1307_s1 + $0x98] sm:$0xff] }
 0x4bc   :  { %617 = vmatpush.bf16.msrb.mxu0 %v961_v44 }
 0x4bd   :  { %864 = vmatmul.msk.bf16.vlgmr.msra.gmra.mxu2 %vm192_vm1, %v432_v45  ;;  %v960_v45 = vld [vmem:[%s1307_s1 + $0x90] sm:$0xff] }
 0x4c0   :  { %618 = vmatpush.bf16.msrb.mxu0 %v960_v45 }
 0x540   :  { %v457_v47 = vpop.f32.mrf.mxu2 }
 0x541   :  { %v462_v48 = vadd.f32 %v457_v47, %v1095_v22  ;;  %v958_v47 = vld [vmem:[%s1307_s1 + $0x80] sm:$0xff] }
 0x543   :  { %v1186_v49 = vadd.f32 %v464_v46, %v462_v48  ;;  %v957_v48 = vld [vmem:[%s1307_s1 + $0x78] sm:$0xff] }
 0x545   :  { %v467_v50 = vsel %vm192_vm1, %v1186_v49, 0.0  ;;  %v475_v53 = vmul.f32 %v1186_v49, %v1186_v49 }
 0x546   :  { %468 = vadd.xlane.f32.xlu0 %v467_v50  ;;  %v956_v50 = vld [vmem:[%s1307_s1 + $0x70] sm:$0xff] }
 0x547   :  { %v477_v55 = vsel %vm192_vm1, %v475_v53, 0.0  ;;  %v524_v53 = vperm.slane %v1133_v1, 6 }
 0x548   :  { %v459_v51 = vpop.f32.mrf.mxu2 }
 0x549   :  { %v463_v52 = vadd.f32 %v459_v51, %v1105_v30  ;;  %v955_v51 = vld [vmem:[%s1307_s1 + $0x68] sm:$0xff] }
 0x54b   :  { %v1193_v54 = vadd.f32 %v464_v46, %v463_v52  ;;  %v959_v46 = vld [vmem:[%s1307_s1 + $0x88] sm:$0xff]  ;;  %v954_v52 = vld [vmem:[%s1307_s1 + $0x60] sm:$0xff] }
 0x54c   :  { %619 = vmatpush.bf16.msrb.mxu0 %v959_v46 }
 0x54d   :  { %v470_v56 = vsel %vm192_vm1, %v1193_v54, 0.0  ;;  %v476_v22 = vmul.f32 %v1193_v54, %v1193_v54 }
 0x54e   :  { %478 = vadd.xlane.f32.xlu0 %v477_v55  ;;  %471 = vadd.xlane.f32.xlu1 %v470_v56 }
 0x54f   :  { %v480_v57 = vsel %vm192_vm1, %v476_v22, 0.0 }
 0x550   :  { %620 = vmatpush.bf16.msrb.mxu0 %v958_v47 }
 0x554   :  { %621 = vmatpush.bf16.msrb.mxu0 %v957_v48 }
 0x556   :  { %481 = vadd.xlane.f32.xlu0 %v480_v57 }
 0x558   :  { %622 = vmatpush.bf16.msrb.mxu0 %v956_v50 }
 0x55c   :  { %623 = vmatpush.bf16.msrb.mxu0 %v955_v51 }
 0x560   :  { %624 = vmatpush.bf16.msrb.mxu0 %v954_v52  ;;  %v1278_v52 = vld [vmem:[%s1309_s2 + $0x28] sm:$0xff] }
 0x5b9   :  { %v469_v58 = vpop.xlane.xlu0 %468 }
 0x5ba   :  { %v473_v30 = vmul.f32 %v469_v58, %v1112_v40 }
 0x5bc   :  { %v485_v60 = vmul.f32 %v473_v30, %v473_v30 }
 0x5c1   :  { %v479_v59 = vpop.xlane.xlu0 %478  ;;  %v472_v62 = vpop.xlane.xlu1 %471 }
 0x5c2   :  { %v483_v61 = vmul.f32 %v479_v59, %v1112_v40  ;;  %v474_v5 = vmul.f32 %v472_v62, %v1112_v40 }
 0x5c4   :  { %v487_v2 = vsub.f32 %v483_v61, %v485_v60  ;;  %v486_v10 = vmul.f32 %v474_v5, %v474_v5 }
 0x5c6   :  { %v489_v4 = vadd.f32 1e-06, %v487_v2 }
 0x5c8   :  { %1000 = vrsqrt.f32 %v489_v4  ;;  %vm497_vm11 = vweird.f32 %v489_v4 }
 0x5c9   :  { %v482_v9 = vpop.xlane.xlu0 %481 }
 0x5ca   :  { %v484_v11 = vmul.f32 %v482_v9, %v1112_v40 }
 0x5cc   :  { %v488_v12 = vsub.f32 %v484_v11, %v486_v10 }
 0x5ce   :  { %v1001_v13 = vpop.eup %1000  ;;  %v490_v14 = vadd.f32 1e-06, %v488_v12 }
 0x5cf   :  { %v492_v15 = vmul.f32 %v1001_v13, %v489_v4  ;;  %vm498_vm10 = vweird.f32 %v1001_v13 }
 0x5d0   :  { %1002 = vrsqrt.f32 %v490_v14  ;;  %vm499_vm12 = vmor %vm497_vm11, %vm498_vm10  ;;  %vm507_vm14 = vweird.f32 %v490_v14 }
 0x5d1   :  { %v493_v16 = vmul.f32 %v1001_v13, %v492_v15 }
 0x5d3   :  { %v494_v17 = vmul.f32 0.5, %v493_v16 }
 0x5d5   :  { %v495_v18 = vsub.f32 1.5, %v494_v17 }
 0x5d6   :  { %v1003_v19 = vpop.eup %1002 }
 0x5d7   :  { %v496_v20 = vmul.f32 %v1001_v13, %v495_v18  ;;  %v502_v21 = vmul.f32 %v1003_v19, %v490_v14  ;;  %vm508_vm13 = vweird.f32 %v1003_v19 }
 0x5d8   :  { %vm509_vm15 = vmor %vm507_vm14, %vm508_vm13 }
 0x5d9   :  { %v500_v24 = vsel %vm499_vm12, %v1001_v13, %v496_v20  ;;  %v503_v25 = vmul.f32 %v1003_v19, %v502_v21  ;;  %v633_v13 = vperm.slane %v1133_v1, 7 }
 0x5da   :  { %v512_v27 = vmul.f32 %v511_v23, %v500_v24 }
 0x5db   :  { %v504_v26 = vmul.f32 0.5, %v503_v25 }
 0x5dc   :  { %v516_v32 = vmul.f32 %v512_v27, %v473_v30  ;;  %v514_v37 = vmul.f32 %v512_v27, %v1186_v49 }
 0x5dd   :  { %v505_v28 = vsub.f32 1.5, %v504_v26 }
 0x5de   :  { %v519_v35 = vsub.f32 %v518_v31, %v516_v32 }
 0x5df   :  { %v506_v29 = vmul.f32 %v1003_v19, %v505_v28 }
 0x5e0   :  { %v521_v41 = vadd.f32 %v519_v35, %v514_v37 }
 0x5e1   :  { %v510_v33 = vsel %vm509_vm15, %v1003_v19, %v506_v29 }
 0x5e2   :  { %v513_v34 = vmul.f32 %v511_v23, %v510_v33 }
 0x5e4   :  { %v517_v36 = vmul.f32 %v513_v34, %v474_v5  ;;  %v515_v38 = vmul.f32 %v513_v34, %v1193_v54  ;;  %v910_v34 = vld [vmem:[%s1308_s0 + $0x58] sm:$0xf0] }
 0x5e6   :  { %v520_v39 = vsub.f32 %v518_v31, %v517_v36 }
 0x5e8   :  { %v522_v42 = vadd.f32 %v520_v39, %v515_v38  ;;  %v935_v38 = vld [vmem:[%s1308_s0 + $0x2c] sm:$0xf]  ;;  %v906_v39 = vld [vmem:[%s1308_s0 + $0x38] sm:$0xf0] }
 0x5ea   :  { %v523_v43 = vpack.c.bf16 %v522_v42, %v521_v41  ;;  %v909_v42 = vor.u32 %v935_v38, %v906_v39 }
 0x5ec   :  { %873 = vmatmul.msk.bf16.vlgmr.msra.gmra.mxu3 %vm192_vm1, %v523_v43 }
 0x66f   :  { %v545_v55 = vpop.f32.mrf.mxu3 }
 0x670   :  { %v546_v56 = vadd.f32 %v545_v55, %v524_v53 }
 0x672   :  { %v552_v22 = vmul.f32 0.044715, %v546_v56  ;;  %v550_v7 = vmul.f32 0.5, %v546_v56 }
 0x674   :  { %v554_v57 = vmul.f32 %v552_v22, %v546_v56  ;;  %v680_v22 = vperm.slane %v1278_v52, 0 }
 0x676   :  { %v556_v58 = vmul.f32 %v554_v57, %v546_v56 }
 0x677   :  { %v547_v30 = vpop.f32.mrf.mxu3 }
 0x678   :  { %v548_v59 = vadd.f32 %v547_v30, %v524_v53  ;;  %v558_v60 = vadd.f32 %v556_v58, %v546_v56 }
 0x67a   :  { %v553_v61 = vmul.f32 0.044715, %v548_v59  ;;  %v560_v63 = vmul.f32 0.7978846, %v558_v60  ;;  %v551_v8 = vmul.f32 0.5, %v548_v59 }
 0x67c   :  { %v555_v62 = vmul.f32 %v553_v61, %v548_v59  ;;  %1004 = vtanh.f32 %v560_v63  ;;  %v687_v61 = vperm.slane %v1278_v52, 1 }
 0x67e   :  { %v557_v0 = vmul.f32 %v555_v62, %v548_v59 }
 0x680   :  { %v559_v2 = vadd.f32 %v557_v0, %v548_v59 }
 0x682   :  { %v561_v3 = vmul.f32 0.7978846, %v559_v2  ;;  %v1005_v4 = vpop.eup %1004 }
 0x683   :  { %v564_v5 = vadd.f32 1.0, %v1005_v4 }
 0x684   :  { %1006 = vtanh.f32 %v561_v3 }
 0x685   :  { %v566_v10 = vmul.f32 %v564_v5, %v550_v7 }
 0x68a   :  { %v1007_v6 = vpop.eup %1006 }
 0x68b   :  { %v565_v9 = vadd.f32 1.0, %v1007_v6 }
 0x68d   :  { %v567_v11 = vmul.f32 %v565_v9, %v551_v8 }
 0x68f   :  { %v568_v12 = vpack.c.bf16 %v567_v11, %v566_v10  ;;  %v965_v10 = vld [vmem:[%s1307_s1 + $0xb8] sm:$0xff]  ;;  %v964_v11 = vld [vmem:[%s1307_s1 + $0xb0] sm:$0xff] }
 0x690   :  { %770 = vmatpush.bf16.msrb.mxu2 %v965_v10 }
 0x691   :  { %625 = vmatmul.bf16.vlgmr.msrb.gmra.mxu0 %v568_v12  ;;  %v963_v12 = vld [vmem:[%s1307_s1 + $0xa8] sm:$0xff] }
 0x694   :  { %771 = vmatpush.bf16.msrb.mxu2 %v964_v11 }
 0x698   :  { %772 = vmatpush.bf16.msrb.mxu2 %v963_v12 }
 0x70e   :  { %v626_v14 = vpop.f32.mrf.mxu0 }
 0x70f   :  { %v631_v15 = vadd.f32 %v626_v14, %v1186_v49  ;;  %v693_v14 = vperm.slane %v1278_v52, 2 }
 0x711   :  { %v1249_v16 = vadd.f32 %v633_v13, %v631_v15 }
 0x713   :  { %v636_v17 = vsel %vm192_vm1, %v1249_v16, 0.0  ;;  %v644_v18 = vmul.f32 %v1249_v16, %v1249_v16 }
 0x714   :  { %637 = vadd.xlane.f32.xlu2 %v636_v17 }
 0x715   :  { %v646_v19 = vsel %vm192_vm1, %v644_v18, 0.0 }
 0x716   :  { %647 = vadd.xlane.f32.xlu0 %v646_v19  ;;  %v628_v20 = vpop.f32.mrf.mxu0 }
 0x717   :  { %v632_v21 = vadd.f32 %v628_v20, %v1193_v54  ;;  %v939_v54 = vld [vmem:[%s1308_s0 + $0x4c] sm:$0xf] }
 0x718   :  { %v913_v35 = vor.u32 %v939_v54, %v910_v34 }
 0x719   :  { %v635_v23 = vadd.f32 %v633_v13, %v632_v21  ;;  %v962_v13 = vld [vmem:[%s1307_s1 + $0xa0] sm:$0xff] }
 0x71a   :  { %711 = vmatpush.bf16.msra.mxu1 %v913_v35  ;;  %773 = vmatpush.bf16.msrb.mxu2 %v962_v13 }
 0x71b   :  { %v639_v1 = vsel %vm192_vm1, %v635_v23, 0.0  ;;  %v645_v49 = vmul.f32 %v635_v23, %v635_v23 }
 0x71d   :  { %v649_v24 = vsel %vm192_vm1, %v645_v49, 0.0 }
 0x71e   :  { %640 = vadd.xlane.f32.xlu0 %v639_v1  ;;  %712 = vmatpush.bf16.msra.mxu1 %v909_v42 }
 0x726   :  { %650 = vadd.xlane.f32.xlu0 %v649_v24 }
 0x787   :  { %v638_v25 = vpop.xlane.xlu2 %637 }
 0x788   :  { %v642_v26 = vmul.f32 %v638_v25, %v1112_v40 }
 0x789   :  { %v648_v27 = vpop.xlane.xlu0 %647 }
 0x78a   :  { %v654_v28 = vmul.f32 %v642_v26, %v642_v26  ;;  %v652_v29 = vmul.f32 %v648_v27, %v1112_v40 }
 0x78c   :  { %v656_v31 = vsub.f32 %v652_v29, %v654_v28 }
 0x78e   :  { %v658_v32 = vadd.f32 1e-06, %v656_v31 }
 0x790   :  { %1008 = vrsqrt.f32 %v658_v32  ;;  %vm666_vm3 = vweird.f32 %v658_v32 }
 0x791   :  { %v641_v33 = vpop.xlane.xlu0 %640 }
 0x792   :  { %v643_v37 = vmul.f32 %v641_v33, %v1112_v40 }
 0x794   :  { %v655_v45 = vmul.f32 %v643_v37, %v643_v37 }
 0x796   :  { %v1009_v36 = vpop.eup %1008 }
 0x797   :  { %v661_v41 = vmul.f32 %v1009_v36, %v658_v32  ;;  %vm667_vm2 = vweird.f32 %v1009_v36 }
 0x798   :  { %vm668_vm4 = vmor %vm666_vm3, %vm667_vm2 }
 0x799   :  { %v662_v43 = vmul.f32 %v1009_v36, %v661_v41  ;;  %v651_v44 = vpop.xlane.xlu0 %650 }
 0x79a   :  { %v653_v46 = vmul.f32 %v651_v44, %v1112_v40 }
 0x79b   :  { %v663_v48 = vmul.f32 0.5, %v662_v43 }
 0x79c   :  { %v657_v47 = vsub.f32 %v653_v46, %v655_v45 }
 0x79d   :  { %v664_v51 = vsub.f32 1.5, %v663_v48 }
 0x79e   :  { %v659_v50 = vadd.f32 1e-06, %v657_v47 }
 0x79f   :  { %v665_v53 = vmul.f32 %v1009_v36, %v664_v51 }
 0x7a0   :  { %1010 = vrsqrt.f32 %v659_v50  ;;  %vm676_vm6 = vweird.f32 %v659_v50 }
 0x7a1   :  { %v669_v40 = vsel %vm668_vm4, %v1009_v36, %v665_v53 }
 0x7a2   :  { %v681_v30 = vmul.f32 %v680_v22, %v669_v40 }
 0x7a4   :  { %v685_v62 = vmul.f32 %v681_v30, %v642_v26  ;;  %v683_v4 = vmul.f32 %v681_v30, %v1249_v16 }
 0x7a6   :  { %v1011_v55 = vpop.eup %1010  ;;  %v688_v2 = vsub.f32 %v687_v61, %v685_v62 }
 0x7a7   :  { %v671_v56 = vmul.f32 %v1011_v55, %v659_v50  ;;  %vm677_vm5 = vweird.f32 %v1011_v55 }
 0x7a8   :  { %vm678_vm7 = vmor %vm676_vm6, %vm677_vm5  ;;  %v690_v7 = vadd.f32 %v688_v2, %v683_v4 }
 0x7a9   :  { %v672_v57 = vmul.f32 %v1011_v55, %v671_v56 }
 0x7ab   :  { %v673_v58 = vmul.f32 0.5, %v672_v57 }
 0x7ad   :  { %v674_v59 = vsub.f32 1.5, %v673_v58 }
 0x7af   :  { %v675_v60 = vmul.f32 %v1011_v55, %v674_v59 }
 0x7b1   :  { %v679_v63 = vsel %vm678_vm7, %v1011_v55, %v675_v60 }
 0x7b2   :  { %v682_v0 = vmul.f32 %v680_v22, %v679_v63 }
 0x7b4   :  { %v686_v3 = vmul.f32 %v682_v0, %v643_v37  ;;  %v684_v5 = vmul.f32 %v682_v0, %v635_v23  ;;  %v738_v37 = vperm.slane %v1278_v52, 3 }
 0x7b6   :  { %v689_v6 = vsub.f32 %v687_v61, %v686_v3 }
 0x7b8   :  { %v691_v8 = vadd.f32 %v689_v6, %v684_v5 }
 0x7ba   :  { %v692_v9 = vpack.c.bf16 %v691_v8, %v690_v7 }
 0x7bc   :  { %914 = vmatmul.msk.bf16.vlgmr.msra.gmra.mxu1 %vm192_vm1, %v692_v9 }
 0x839   :  { %v714_v15 = vpop.f32.mrf.mxu1 }
 0x83a   :  { %v715_v16 = vadd.f32 %v714_v15, %v693_v14 }
 0x83c   :  { %v721_v17 = vmul.f32 0.044715, %v715_v16  ;;  %v719_v32 = vmul.f32 0.5, %v715_v16 }
 0x83e   :  { %v723_v18 = vmul.f32 %v721_v17, %v715_v16 }
 0x840   :  { %v725_v19 = vmul.f32 %v723_v18, %v715_v16 }
 0x841   :  { %v716_v20 = vpop.f32.mrf.mxu1 }
 0x842   :  { %v727_v21 = vadd.f32 %v725_v19, %v715_v16  ;;  %v717_v23 = vadd.f32 %v716_v20, %v693_v14 }
 0x844   :  { %v722_v1 = vmul.f32 0.044715, %v717_v23  ;;  %v729_v49 = vmul.f32 0.7978846, %v727_v21  ;;  %v720_v33 = vmul.f32 0.5, %v717_v23 }
 0x846   :  { %v724_v24 = vmul.f32 %v722_v1, %v717_v23  ;;  %1012 = vtanh.f32 %v729_v49 }
 0x848   :  { %v726_v25 = vmul.f32 %v724_v24, %v717_v23 }
 0x84a   :  { %v728_v26 = vadd.f32 %v726_v25, %v717_v23 }
 0x84c   :  { %v730_v27 = vmul.f32 0.7978846, %v728_v26  ;;  %v1013_v28 = vpop.eup %1012 }
 0x84d   :  { %v733_v29 = vadd.f32 1.0, %v1013_v28 }
 0x84e   :  { %1014 = vtanh.f32 %v730_v27 }
 0x84f   :  { %v735_v34 = vmul.f32 %v733_v29, %v719_v32 }
 0x854   :  { %v1015_v31 = vpop.eup %1014 }
 0x855   :  { %v734_v54 = vadd.f32 1.0, %v1015_v31 }
 0x857   :  { %v736_v35 = vmul.f32 %v734_v54, %v720_v33 }
 0x859   :  { %v737_v36 = vpack.c.bf16 %v736_v35, %v735_v34 }
 0x85b   :  { %931 = vmatmul.msk.bf16.vlgmr.msrb.gmra.mxu2 %vm160_vm0, %v737_v36 }
 0x8de   :  { %v775_v38 = vpop.f32.mrf.mxu2 }
 0x8df   :  { %v776_v39 = vadd.f32 %v775_v38, %v738_v37 }
 0x8e1   :  { %780 = vst.msk [vmem:[%s1310_s3] sm:$0xff] %vm291_vm9, %v776_v39 }
 0x8e6   :  { %v777_v41 = vpop.f32.mrf.mxu2 }
 0x8e7   :  { %v778_v42 = vadd.f32 %v777_v41, %v738_v37 }
 0x8e9   :  { %781 = vst.msk [vmem:[%s1310_s3 + $0x8] sm:$0xff] %vm291_vm9, %v778_v42 }

</bundles_post_ra>
